<compile_context>
chip_gen: v7x
topology: tpu7x:2x2x1
jax: 0.10.0
libtpu: 0.0.40
codegen_flags: <defaults>
</compile_context>

<pallas_src>
import functools

import jax
import jax.numpy as jnp
from jax.experimental import pallas as pl
from jax.experimental.pallas import tpu as pltpu


def _coef_kernel(x_ref, w_ref, b_ref, o_ref, *, C, OC):
    # x_ref: VMEM (C, T)    -- spatial on lanes
    # w_ref: SMEM (OC*C,)   -- 1x1 conv weights as scalars, row-major (o, c)
    # b_ref: SMEM (OC,)     -- bias scalars
    # o_ref: VMEM (OC, T)
    xs = [x_ref[c:c + 1, :] for c in range(C)]            # each (1, T)
    for o in range(OC):
        acc = xs[0] * w_ref[o * C + 0]                     # scalar * vector (VPU)
        for c in range(1, C):
            acc = acc + xs[c] * w_ref[o * C + c]
        o_ref[o:o + 1, :] = (acc + b_ref[o]).astype(o_ref.dtype)


def coef_forward(x_nchw, weight, bias):
    """Equivalent of Coef.forward.

    Args:
      x_nchw: (N, C, H, W) float32
      weight: (OC, C) float32   -- Conv2d 1x1 weight squeezed from (OC, C, 1, 1)
      bias:   (OC,)  float32
    Returns:
      (XF, XB, XW), each (N, 1, H, W)
    """
    N, C, H, W = x_nchw.shape
    OC = weight.shape[0]
    HW = H * W

    # Free reshape (contiguous trailing-dim merge) -- no transpose, no copy.
    x3 = x_nchw.reshape(N, C, HW)

    # Lane-dense tile along the spatial axis.  The budget keeps a
    # double-buffered input + output block comfortably inside VMEM even on
    # v7x (64 MiB physical, 32 MiB default scoped limit).
    bytes_per_elem = x_nchw.dtype.itemsize
    budget = 4 * 1024 * 1024  # per-block byte budget for the larger operand
    tile_cap = max(128, (budget // (max(C, OC) * bytes_per_elem)) // 128 * 128)
    if HW <= tile_cap:
        tile_hw = HW                 # single spatial block == full dim (legal)
        grid_hw = 1
        hw_pad = HW
    else:
        tile_hw = tile_cap           # multiple of 128 -> unmasked vst
        grid_hw = pl.cdiv(HW, tile_hw)
        hw_pad = grid_hw * tile_hw   # only the OUTPUT is padded; sliced back

    w_flat = weight.reshape(OC * C).astype(jnp.float32)
    b_vec = bias.reshape(OC).astype(jnp.float32)

    kernel = functools.partial(_coef_kernel, C=C, OC=OC)

    out = pl.pallas_call(
        kernel,
        out_shape=jax.ShapeDtypeStruct((N, OC, hw_pad), x_nchw.dtype),
        grid=(N, grid_hw),
        in_specs=[
            # x tile: batch squeezed, full channel dim, lane-dense spatial tile.
            pl.BlockSpec((None, C, tile_hw), lambda n, j: (n, 0, j)),
            # weight / bias: whole arrays in SMEM (scalar operands).
            pl.BlockSpec(memory_space=pltpu.MemorySpace.SMEM),
            pl.BlockSpec(memory_space=pltpu.MemorySpace.SMEM),
        ],
        out_specs=pl.BlockSpec((None, OC, tile_hw), lambda n, j: (n, 0, j)),
        compiler_params=pltpu.CompilerParams(
            dimension_semantics=("parallel", "parallel")),
    )(x3, w_flat, b_vec)

    feat = out[:, :, :HW].reshape(N, OC, H, W)   # no transpose; slice is a
                                                 # no-op when HW % tile == 0

    # torch.split(feat, [1, 1, 1], dim=1) -- free contiguous channel slices.
    XF = feat[:, 0:1, :, :]
    XB = feat[:, 1:2, :, :]
    XW = feat[:, 2:3, :, :]
    return XF, XB, XW


if __name__ == "__main__":
    key = jax.random.PRNGKey(0)
    k_x, k_w, k_b = jax.random.split(key, 3)

    N, C, H, W = 2, 4, 16, 16
    OC = 3

    x = jax.random.normal(k_x, (N, C, H, W), dtype=jnp.float32)

    # Deterministic parameter init mirroring nn.Conv2d default:
    # U(-bound, bound) with bound = 1/sqrt(fan_in), fan_in = C * 1 * 1.
    bound = 1.0 / (C ** 0.5)
    weight = jax.random.uniform(k_w, (OC, C), minval=-bound, maxval=bound,
                                dtype=jnp.float32)
    bias = jax.random.uniform(k_b, (OC,), minval=-bound, maxval=bound,
                              dtype=jnp.float32)

    XF, XB, XW = coef_forward(x, weight, bias)
    jax.block_until_ready((XF, XB, XW))

    # Correctness check against a plain-JAX reference of the 1x1 conv + split.
    feat_ref = jnp.einsum("nchw,oc->nohw", x, weight) + bias[None, :, None, None]
    ref = (feat_ref[:, 0:1], feat_ref[:, 1:2], feat_ref[:, 2:3])
    for got, want in zip((XF, XB, XW), ref):
        assert got.shape == (N, 1, H, W), got.shape
        assert jnp.allclose(got, want, atol=1e-5, rtol=1e-5)

    print("KERNEL_OK")
</pallas_src>

<mosaic_0001>
module attributes {stable_mosaic.version = 11 : i64} {
  func.func @_coef_kernel(%arg0: i32, %arg1: i32, %arg2: memref<1x4x256xf32, #tpu.memory_space<vmem>>, %arg3: memref<12xf32, #tpu.memory_space<smem>>, %arg4: memref<3xf32, #tpu.memory_space<smem>>, %arg5: memref<1x3x256xf32, #tpu.memory_space<vmem>>) attributes {dimension_semantics = [#tpu.dimension_semantics<parallel>, #tpu.dimension_semantics<parallel>], iteration_bounds = array<i64: 2, 1>, scalar_prefetch = 0 : i64, scratch_operands = 0 : i64, tpu.core_type = #tpu.core_type<tc>, window_params = [{transform_indices = @transform_0, window_bounds = array<i64: 1, 4, 256>}, {transform_indices = @transform_1, window_bounds = array<i64: 12>}, {transform_indices = @transform_2, window_bounds = array<i64: 3>}, {transform_indices = @transform_3, window_bounds = array<i64: 1, 3, 256>}]} {
    %c0 = arith.constant 0 : index
    %c0_0 = arith.constant 0 : index
    %c0_1 = arith.constant 0 : index
    %0 = vector.load %arg2[%c0, %c0_0, %c0_1] : memref<1x4x256xf32, #tpu.memory_space<vmem>>, vector<1x1x256xf32>
    %1 = vector.shape_cast %0 : vector<1x1x256xf32> to vector<1x256xf32>
    %c0_2 = arith.constant 0 : index
    %c1 = arith.constant 1 : index
    %c0_3 = arith.constant 0 : index
    %2 = vector.load %arg2[%c0_2, %c1, %c0_3] : memref<1x4x256xf32, #tpu.memory_space<vmem>>, vector<1x1x256xf32>
    %3 = vector.shape_cast %2 : vector<1x1x256xf32> to vector<1x256xf32>
    %c0_4 = arith.constant 0 : index
    %c2 = arith.constant 2 : index
    %c0_5 = arith.constant 0 : index
    %4 = vector.load %arg2[%c0_4, %c2, %c0_5] : memref<1x4x256xf32, #tpu.memory_space<vmem>>, vector<1x1x256xf32>
    %5 = vector.shape_cast %4 : vector<1x1x256xf32> to vector<1x256xf32>
    %c0_6 = arith.constant 0 : index
    %c3 = arith.constant 3 : index
    %c0_7 = arith.constant 0 : index
    %6 = vector.load %arg2[%c0_6, %c3, %c0_7] : memref<1x4x256xf32, #tpu.memory_space<vmem>>, vector<1x1x256xf32>
    %7 = vector.shape_cast %6 : vector<1x1x256xf32> to vector<1x256xf32>
    %c0_8 = arith.constant 0 : index
    %8 = memref.load %arg3[%c0_8] : memref<12xf32, #tpu.memory_space<smem>>
    %9 = vector.broadcast %8 : f32 to vector<1x256xf32>
    %10 = arith.mulf %1, %9 : vector<1x256xf32>
    %c1_9 = arith.constant 1 : index
    %11 = memref.load %arg3[%c1_9] : memref<12xf32, #tpu.memory_space<smem>>
    %12 = vector.broadcast %11 : f32 to vector<1x256xf32>
    %13 = arith.mulf %3, %12 : vector<1x256xf32>
    %14 = arith.addf %10, %13 : vector<1x256xf32>
    %c2_10 = arith.constant 2 : index
    %15 = memref.load %arg3[%c2_10] : memref<12xf32, #tpu.memory_space<smem>>
    %16 = vector.broadcast %15 : f32 to vector<1x256xf32>
    %17 = arith.mulf %5, %16 : vector<1x256xf32>
    %18 = arith.addf %14, %17 : vector<1x256xf32>
    %c3_11 = arith.constant 3 : index
    %19 = memref.load %arg3[%c3_11] : memref<12xf32, #tpu.memory_space<smem>>
    %20 = vector.broadcast %19 : f32 to vector<1x256xf32>
    %21 = arith.mulf %7, %20 : vector<1x256xf32>
    %22 = arith.addf %18, %21 : vector<1x256xf32>
    %c0_12 = arith.constant 0 : index
    %23 = memref.load %arg4[%c0_12] : memref<3xf32, #tpu.memory_space<smem>>
    %24 = vector.broadcast %23 : f32 to vector<1x256xf32>
    %25 = arith.addf %22, %24 : vector<1x256xf32>
    %c0_13 = arith.constant 0 : index
    %c0_14 = arith.constant 0 : index
    %c0_15 = arith.constant 0 : index
    %26 = vector.load %arg5[%c0_13, %c0_14, %c0_15] : memref<1x3x256xf32, #tpu.memory_space<vmem>>, vector<1x1x256xf32>
    %27 = vector.shape_cast %26 : vector<1x1x256xf32> to vector<1x256xf32>
    %28 = vector.shape_cast %25 : vector<1x256xf32> to vector<1x1x256xf32>
    tpu.vector_store %arg5[%c0_13, %c0_14, %c0_15], %28 {strides = array<i32>} : memref<1x3x256xf32, #tpu.memory_space<vmem>>, vector<1x1x256xf32>,
    %c4 = arith.constant 4 : index
    %29 = memref.load %arg3[%c4] : memref<12xf32, #tpu.memory_space<smem>>
    %30 = vector.broadcast %29 : f32 to vector<1x256xf32>
    %31 = arith.mulf %1, %30 : vector<1x256xf32>
    %c5 = arith.constant 5 : index
    %32 = memref.load %arg3[%c5] : memref<12xf32, #tpu.memory_space<smem>>
    %33 = vector.broadcast %32 : f32 to vector<1x256xf32>
    %34 = arith.mulf %3, %33 : vector<1x256xf32>
    %35 = arith.addf %31, %34 : vector<1x256xf32>
    %c6 = arith.constant 6 : index
    %36 = memref.load %arg3[%c6] : memref<12xf32, #tpu.memory_space<smem>>
    %37 = vector.broadcast %36 : f32 to vector<1x256xf32>
    %38 = arith.mulf %5, %37 : vector<1x256xf32>
    %39 = arith.addf %35, %38 : vector<1x256xf32>
    %c7 = arith.constant 7 : index
    %40 = memref.load %arg3[%c7] : memref<12xf32, #tpu.memory_space<smem>>
    %41 = vector.broadcast %40 : f32 to vector<1x256xf32>
    %42 = arith.mulf %7, %41 : vector<1x256xf32>
    %43 = arith.addf %39, %42 : vector<1x256xf32>
    %c1_16 = arith.constant 1 : index
    %44 = memref.load %arg4[%c1_16] : memref<3xf32, #tpu.memory_space<smem>>
    %45 = vector.broadcast %44 : f32 to vector<1x256xf32>
    %46 = arith.addf %43, %45 : vector<1x256xf32>
    %c0_17 = arith.constant 0 : index
    %c1_18 = arith.constant 1 : index
    %c0_19 = arith.constant 0 : index
    %47 = vector.load %arg5[%c0_17, %c1_18, %c0_19] : memref<1x3x256xf32, #tpu.memory_space<vmem>>, vector<1x1x256xf32>
    %48 = vector.shape_cast %47 : vector<1x1x256xf32> to vector<1x256xf32>
    %49 = vector.shape_cast %46 : vector<1x256xf32> to vector<1x1x256xf32>
    tpu.vector_store %arg5[%c0_17, %c1_18, %c0_19], %49 {strides = array<i32>} : memref<1x3x256xf32, #tpu.memory_space<vmem>>, vector<1x1x256xf32>,
    %c8 = arith.constant 8 : index
    %50 = memref.load %arg3[%c8] : memref<12xf32, #tpu.memory_space<smem>>
    %51 = vector.broadcast %50 : f32 to vector<1x256xf32>
    %52 = arith.mulf %1, %51 : vector<1x256xf32>
    %c9 = arith.constant 9 : index
    %53 = memref.load %arg3[%c9] : memref<12xf32, #tpu.memory_space<smem>>
    %54 = vector.broadcast %53 : f32 to vector<1x256xf32>
    %55 = arith.mulf %3, %54 : vector<1x256xf32>
    %56 = arith.addf %52, %55 : vector<1x256xf32>
    %c10 = arith.constant 10 : index
    %57 = memref.load %arg3[%c10] : memref<12xf32, #tpu.memory_space<smem>>
    %58 = vector.broadcast %57 : f32 to vector<1x256xf32>
    %59 = arith.mulf %5, %58 : vector<1x256xf32>
    %60 = arith.addf %56, %59 : vector<1x256xf32>
    %c11 = arith.constant 11 : index
    %61 = memref.load %arg3[%c11] : memref<12xf32, #tpu.memory_space<smem>>
    %62 = vector.broadcast %61 : f32 to vector<1x256xf32>
    %63 = arith.mulf %7, %62 : vector<1x256xf32>
    %64 = arith.addf %60, %63 : vector<1x256xf32>
    %c2_20 = arith.constant 2 : index
    %65 = memref.load %arg4[%c2_20] : memref<3xf32, #tpu.memory_space<smem>>
    %66 = vector.broadcast %65 : f32 to vector<1x256xf32>
    %67 = arith.addf %64, %66 : vector<1x256xf32>
    %c0_21 = arith.constant 0 : index
    %c2_22 = arith.constant 2 : index
    %c0_23 = arith.constant 0 : index
    %68 = vector.load %arg5[%c0_21, %c2_22, %c0_23] : memref<1x3x256xf32, #tpu.memory_space<vmem>>, vector<1x1x256xf32>
    %69 = vector.shape_cast %68 : vector<1x1x256xf32> to vector<1x256xf32>
    %70 = vector.shape_cast %67 : vector<1x256xf32> to vector<1x1x256xf32>
    tpu.vector_store %arg5[%c0_21, %c2_22, %c0_23], %70 {strides = array<i32>} : memref<1x3x256xf32, #tpu.memory_space<vmem>>, vector<1x1x256xf32>,
    return
  }
  func.func @transform_0(%arg0: i32, %arg1: i32) -> (i32, i32, i32) {
    %c0_i32 = arith.constant 0 : i32
    %c0_i32_0 = arith.constant 0 : i32
    return %arg0, %c0_i32, %arg1 : i32, i32, i32
  }
  func.func @transform_1(%arg0: i32, %arg1: i32) -> i32 {
    %c0_i32 = arith.constant 0 : i32
    %c0_i32_0 = arith.constant 0 : i32
    return %c0_i32 : i32
  }
  func.func @transform_2(%arg0: i32, %arg1: i32) -> i32 {
    %c0_i32 = arith.constant 0 : i32
    %c0_i32_0 = arith.constant 0 : i32
    return %c0_i32 : i32
  }
  func.func @transform_3(%arg0: i32, %arg1: i32) -> (i32, i32, i32) {
    %c0_i32 = arith.constant 0 : i32
    %c0_i32_0 = arith.constant 0 : i32
    return %arg0, %c0_i32, %arg1 : i32, i32, i32
  }
}

</mosaic_0001>

<bundles_post_ra>
// kernel: tpu_custom_call.1
= control target key start
LH: loop header
LB: loop body
LE: loop exit
PB: predicated region body
PF: predicated region fallthrough
CT: control target
= control target key end

     0   :  { %8 = vsyncpa [#allocation3], 0  ;;  %s856_s0 = inlined_call_operand.hbm [shape: f32[2,4,256], index: 0, kind: input, shape index: {}]   ;;  %s857_s1 = inlined_call_operand.vmem [shape: f32[12], index: 1, kind: input, shape index: {}]   ;;  %s858_s2 = inlined_call_operand.vmem [shape: f32[3], index: 2, kind: input, shape index: {}]   ;;  %s859_s3 = inlined_call_operand.vmem [shape: f32[2,3,256], index: 3, kind: output, shape index: {}]  }
   0x1   :  { %10 = vsyncpa [#allocation3 + $0x1], 0 }
   0x2   :  { %11 = vsyncpa [#allocation4], 0 }
   0x3   :  { %12 = vsyncpa [#allocation7], 0  ;;  %s687_s12 = smov 0   ;;  %s689_s13 = smov 0  }
   0x4   :  { %s691_s14 = smov 0   ;;  %s693_s15 = smov 0  }
   0x5   :  { %s695_s16 = smov 0   ;;  %s697_s17 = smov 0  }
   0x6 LB: > { %s431_s18 = sadd.s32 4294967295, %s662_s17   ;;  %p52_p0 = scmp.ne.s32.totalorder %s646_s13, %s642_s12  ;;  %s662_s17 = sphi %s697_s17, %s18_s17   ;;  %s658_s16 = sphi %s695_s16, %s877_s16   ;;  %s654_s15 = sphi %s693_s15, %s876_s15   ;;  %s650_s14 = sphi %s691_s14, %s875_s14   ;;  %s646_s13 = sphi %s689_s13, %s874_s13   ;;  %s642_s12 = sphi %s687_s12, %s873_s12  }
   0x7   : > { %p717_p1 = scmp.eq.s32.totalorder %s431_s18, 0  ;;  %p433_p2 = scmp.ge.s32.totalorder %s662_s17, 1 }
   0x8   : > { %p133_p3 = scmp.lt.s32.totalorder %s662_s17, 3  ;;  %s146_s23 = sshll.u32 %s857_s1, 4  ;;  %s147_s23 = int_to_ptr.vmem [resolvable:$true] %s146_s23 }
   0x9   : > { %s864_s19 = scalar_select %p717_p1, 1, 0 }
   0xa   : > { %p725_p4 = por %p717_p1, %p52_p0  ;;  %p732_p5 = pnand %p433_p2, %p133_p3 }
   0xb   : > { %s157_s27 = sshll.u32 %s858_s2, 4  ;;  %s544_s29 = scalar_lea.vmem %s147_s23, 16  ;;  %s158_s27 = int_to_ptr.vmem [resolvable:$true] %s157_s27 }
   0xc   : > { %s865_s20 = scalar_select %p725_p4, 1, 0 }
   0xd   : > { %s866_s24 = scalar_select %p732_p5, 1, 0 }
   0xe   : > { %p478_p6 = pneg %p732_p5  ;;  %p545_p8 = scmp.ne.s32.totalorder %s147_s23, %s544_s29 }
   0xf   : > { %p552_p12 = scmp.lt.s32.totalorder %s147_s23, %s147_s23  ;;  %p553_p13 = scmp.lt.s32.totalorder %s544_s29, %s544_s29 }
  0x10   : > { %p743_p7 = pnand %p478_p6, %p717_p1 }
  0x11   : > { %p554_p0 = por %p553_p13, %p552_p12 }
  0x12   : > { %p546_p9 = pneg %p743_p7 }
  0x14   : > { %p547_p10 = pnand %p546_p9, %p545_p8 }
  0x16   : > { %p548_p11 = pneg %p547_p10 }
  0x18   : > { %p555_p2 = pnand %p554_p0, %p548_p11 }
  0x1a   : > { %558 = shalt.err (!%p555_p2)
}
  0x1b   : > { %s664_s30 = smov [#allocation5]   ;;  %s559_s4 = scalar_lea.vmem %s158_s27, 16 }
  0x1c   : > { %481 = dma.vmem_to_smem (!%p743_p7), %s147_s23, 16, %s664_s30, [#allocation4]  }
  0x1d   : > { %p560_p3 = scmp.ne.s32.totalorder %s158_s27, %s559_s4  ;;  %p567_p4 = scmp.lt.s32.totalorder %s158_s27, %s158_s27 }
  0x1e   : > { %p568_p5 = scmp.lt.s32.totalorder %s559_s4, %s559_s4 }
  0x1f   : > { %p562_p6 = pnand %p560_p3, %p546_p9 }
  0x20   : > { %p569_p8 = por %p568_p5, %p567_p4 }
  0x21   : > { %p563_p1 = pneg %p562_p6 }
  0x23   : > { %p570_p10 = pnand %p569_p8, %p563_p1 }
  0x25   : > { %573 = shalt.err (!%p570_p10)
}
  0x26   : > { %s665_s5 = smov [#allocation6]   ;;  %s30_s6 = sadd.s32 1, %s658_s16 }
  0x27   : > { %484 = dma.vmem_to_smem (!%p743_p7), %s158_s27, 16, %s665_s5, [#allocation7]  }
  0x28   : > { %s39_s7 = sadd.s32 1, %s650_s14  ;;  %p32_p9 = scmp.ge.s32.totalorder %s30_s6, 2 }
  0x29   : > { %p46_p1 = scmp.ne.s32.totalorder %s650_s14, %s646_s13  ;;  %p47_p4 = scmp.eq.s32.totalorder %s662_s17, 0 }
  0x2a   : > { %p491_p5 = scmp.lt.s32.totalorder %s662_s17, 2  ;;  %s879_s6 = smov (%p32_p9, %s30_s6), 0 }
  0x2b   : > { %p48_p11 = por %p47_p4, %p46_p1  ;;  %s168_s8 = sand.u32 1, %s650_s14  }
  0x2c   : > { %s34_s9 = ssub.s32 %s658_s16, %s879_s6  ;;  %s437_s10 = sshll.u32 %s168_s8, 3 }
  0x2d   : > { %p37_p12 = scmp.eq.s32.totalorder %s34_s9, 0  ;;  %s466_s11 = sshll.u32 %s658_s16, 7 }
  0x2e   : > { %s771_s22 = scalar_lea.hbm %s856_s0, %s466_s11  ;;  %s172_s23 = scalar_lea.vmem [#allocation2], %s437_s10 }
  0x2f   : > { %s766_s12 = scalar_select %p37_p12, %s650_s14, %s39_s7  }
  0x30   : > { %s182_s25 = sshll.u32 %s172_s23, 4  ;;  %p777_p7 = pnand %p491_p5, %p48_p11  ;;  %s773_s25 = int_to_ptr.vmem [resolvable:$true] %s182_s25 }
  0x31   : > { %s169_s27 = scalar_lea.sflag [#allocation3], %s168_s8  ;;  %s574_s28 = scalar_lea.hbm %s771_s22, 128 }
  0x32   : > { %p575_p13 = scmp.ne.s32.totalorder %s771_s22, %s574_s28  ;;  %p576_p0 = pneg %p777_p7 }
  0x33   : > { %s579_s4 = scalar_lea.hbm %s856_s0, 256  ;;  %p580_p6 = scmp.lt.u32.totalorder %s771_s22, %s856_s0 }
  0x34   : > { %p577_p2 = pnand %p576_p0, %p575_p13  ;;  %p581_p8 = scmp.lt.u32.totalorder %s579_s4, %s574_s28 }
  0x35   : > { %p583_p9 = scmp.lt.u32.totalorder %s574_s28, %s771_s22 }
  0x36   : > { %p578_p3 = pneg %p577_p2  ;;  %p582_p10 = por %p581_p8, %p580_p6 }
  0x38   : > { %p584_p1 = por %p583_p9, %p582_p10 }
  0x3a   : > { %p585_p4 = pnand %p584_p1, %p578_p3 }
  0x3c   : > { %588 = shalt.err (!%p585_p4)
}
  0x3d   : > { %s589_s8 = scalar_lea.vmem %s773_s25, 128  ;;  %s666_s9 = smov [#allocation2]  }
  0x3e   : > { %p590_p5 = scmp.ne.s32.totalorder %s773_s25, %s589_s8  ;;  %s594_s10 = sshll.u32 %s666_s9, 4  ;;  %s595_s10 = int_to_ptr.vmem [resolvable:$false] %s594_s10 }
  0x3f   : > { %s596_s11 = scalar_lea.vmem %s595_s10, 256  ;;  %p597_p13 = scmp.lt.s32.totalorder %s773_s25, %s595_s10 }
  0x40   : > { %p592_p11 = pnand %p590_p5, %p576_p0  ;;  %p598_p2 = scmp.lt.s32.totalorder %s596_s11, %s589_s8 }
  0x42   : > { %p593_p12 = pneg %p592_p11  ;;  %p599_p6 = por %p598_p2, %p597_p13 }
  0x44   : > { %p600_p8 = pnand %p599_p6, %p593_p12 }
  0x46   : > { %603 = shalt.err (!%p600_p8)
}
  0x47   : > { %488 = dma.hbm_to_vmem [thread:$0]  (!%p777_p7), %s771_s22, 128, %s773_s25, %s169_s27  }
  0x48   : > { %p869_p3 = scmp.ne.s32.totalorder %s866_s24, 0 }
  0x49   : > { %s193_s18 = sand.u32 (!%p869_p3), 1, %s646_s13   ;;  %p870_p0 = scmp.ne.s32.totalorder (!%p869_p3), %s865_s20, 0 }
  0x4a   : > { %191 = sbr.rel (%p869_p3) target bundleno = 113 (0x71), region = 32  ;;  %s441_s21 = sshll.u32 (!%p869_p3), %s193_s18, 3 }
  0x4b   : > { %s194_s23 = scalar_lea.sflag (!%p869_p3), [#allocation3], %s193_s18  ;;  %s197_s28 = scalar_lea.vmem (!%p869_p3), [#allocation2], %s441_s21 }
  0x51   : > { %629 = dma.done.wait (%p870_p0), %s194_s23, 128  }
  0x52   : > { %631 = vsyncadd (%p870_p0), %s194_s23, 4294967168  ;;  %p871_p10 = scmp.ne.s32.totalorder %s864_s19, 0 }
  0x54   : > { %633 = dma.done.wait (%p871_p10), [#allocation4], 16  }
  0x55   : > { %635 = vsyncadd (%p871_p10), [#allocation4], 4294967280 }
  0x56   : > { %637 = dma.done.wait (%p871_p10), [#allocation7], 16  }
  0x57   : > { %639 = vsyncadd (%p871_p10), [#allocation7], 4294967280 }
  0x58   : > { %210 = sfence }
  0x59   : > { %p235_p7 = scmp.lt.s32.totalorder %s654_s15, 1  ;;  %s251_s24 = sld [smem:[#allocation5]]  ;;  %v244_v0 = vld [vmem:[%s197_s28] ss:$4 sm:$0x3]  ;;  %v269_v11 = vlaneseq }
  0x5a   : > { %s449_s20 = sld [smem:[#allocation5 + $0x1]]  ;;  %s450_s22 = sld [smem:[#allocation5 + $0x2]]  ;;  %v446_v1 = vld [vmem:[%s197_s28 + $0x1] ss:$4 sm:$0x3] }
  0x5b   : > { %s881_s15 = smov (!%p235_p7, %s654_s15), 1  ;;  %s451_s25 = sld [smem:[#allocation5 + $0x3]]  ;;  %v447_v2 = vld [vmem:[%s197_s28 + $0x2] ss:$4 sm:$0x3]  ;;  %vm271_vm0 = vcmp.lt.s32.totalorder %v269_v11, 256 }
  0x5c   : > { %s825_s26 = sld [smem:[#allocation6]]  ;;  %s452_s27 = sld [smem:[#allocation5 + $0x4]]  ;;  %v448_v4 = vld [vmem:[%s197_s28 + $0x3] ss:$4 sm:$0x3] }
  0x5d   : > { %s453_s29 = sld [smem:[#allocation5 + $0x5]]  ;;  %s454_s19 = sld [smem:[#allocation5 + $0x6]] }
  0x5e   : > { %s455_s30 = sld [smem:[#allocation5 + $0x7]]  ;;  %s458_s4 = sld [smem:[#allocation5 + $0x8]] }
  0x5f   : > { %v252_v3 = vstv %s251_s24  ;;  %s459_s5 = sld [smem:[#allocation5 + $0x9]]  ;;  %s460_s7 = sld [smem:[#allocation5 + $0xa]] }
  0x60   : > { %v253_v5 = vmul.f32 %v252_v3, %v244_v0  ;;  %v255_v6 = vstv %s449_s20  ;;  %v259_v7 = vstv %s450_s22  ;;  %s827_s8 = sld [smem:[#allocation6 + $0x1]]  ;;  %s829_s9 = sld [smem:[#allocation5 + $0xb]] }
  0x61   : > { %v256_v8 = vmul.f32 %v446_v1, %v255_v6  ;;  %v260_v9 = vmul.f32 %v447_v2, %v259_v7  ;;  %v263_v10 = vstv %s451_s25  ;;  %s462_s10 = sld [smem:[#allocation6 + $0x2]]  ;;  %s467_s11 = sshll.u32 %s881_s15, 3 }
  0x62   : > { %v264_v13 = vmul.f32 %v448_v4, %v263_v10  ;;  %v275_v14 = vstv %s452_s27  ;;  %v267_v21 = vstv %s825_s26  ;;  %s242_s23 = scalar_lea.vmem %s859_s3, %s467_s11 }
  0x63   : > { %v257_v12 = vadd.f32 %v256_v8, %v253_v5  ;;  %v278_v15 = vstv %s453_s29  ;;  %v276_v16 = vmul.f32 %v275_v14, %v244_v0  ;;  %v282_v18 = vstv %s454_s19 }
  0x64   : > { %v279_v17 = vmul.f32 %v446_v1, %v278_v15  ;;  %v286_v19 = vstv %s455_s30  ;;  %v283_v22 = vmul.f32 %v447_v2, %v282_v18  ;;  %v295_v25 = vstv %s458_s4 }
  0x65   : > { %v261_v20 = vadd.f32 %v260_v9, %v257_v12  ;;  %v287_v23 = vmul.f32 %v448_v4, %v286_v19  ;;  %v298_v26 = vstv %s459_s5  ;;  %v302_v27 = vstv %s460_s7 }
  0x66   : > { %v280_v24 = vadd.f32 %v279_v17, %v276_v16  ;;  %v296_v29 = vmul.f32 %v295_v25, %v244_v0  ;;  %v299_v30 = vmul.f32 %v446_v1, %v298_v26  ;;  %v303_v31 = vmul.f32 %v447_v2, %v302_v27 }
  0x67   : > { %v265_v28 = vadd.f32 %v264_v13, %v261_v20  ;;  %v306_v33 = vstv %s829_s9  ;;  %v290_v35 = vstv %s827_s8  ;;  %v310_v41 = vstv %s462_s10 }
  0x68   : > { %v284_v32 = vadd.f32 %v283_v22, %v280_v24  ;;  %v300_v36 = vadd.f32 %v299_v30, %v296_v29  ;;  %v307_v37 = vmul.f32 %v448_v4, %v306_v33 }
  0x69   : > { %v268_v34 = vadd.f32 %v267_v21, %v265_v28 }
  0x6a   : > { %v288_v38 = vadd.f32 %v287_v23, %v284_v32  ;;  %v304_v39 = vadd.f32 %v303_v31, %v300_v36 }
  0x6b   : > { %273 = vst.msk [vmem:[%s242_s23] ss:$4 sm:$0x3] %vm271_vm0, %v268_v34 }
  0x6c   : > { %v291_v40 = vadd.f32 %v290_v35, %v288_v38  ;;  %v308_v42 = vadd.f32 %v307_v37, %v304_v39 }
  0x6e   : > { %457 = vst.msk [vmem:[%s242_s23 + $0x1] ss:$4 sm:$0x3] %vm271_vm0, %v291_v40  ;;  %v311_v43 = vadd.f32 %v310_v41, %v308_v42 }
  0x70   : > { %463 = vst.msk [vmem:[%s242_s23 + $0x2] ss:$4 sm:$0x3] %vm271_vm0, %v311_v43 }
  0x71 PF: > { %s18_s17 = sadd.s32 1, %s662_s17   ;;  %s872_s15 = smov %s766_s12 }
  0x72   : > { %p15_p9 = scmp.ge.s32.totalorder %s18_s17, 4   ;;  %s873_s12 = smov %s646_s13 }
  0x73   : > { %s874_s13 = smov %s650_s14  ;;  %s875_s14 = smov %s872_s15 }
  0x74   : > { %s876_s15 = smov %s658_s16  ;;  %s877_s16 = smov %s879_s6 }
  0x75   :  { %17 = sbr.rel (!%p15_p9) target bundleno = 6 (0x6), region = 86 }
  0x7c   :  { %344 = vsyncpa [#allocation3], 1 }
  0x7d   :  { %346 = vsyncpa [#allocation3 + $0x1], 1 }
  0x7e   :  { %347 = vsyncpa [#allocation4], 1 }
  0x7f   :  { %349 = vsyncpa [#allocation4 + $0x1], 1 }
  0x80   :  { %350 = vsyncpa [#allocation7], 1 }

</bundles_post_ra>
